<compile_context>
chip_gen: v7x
topology: tpu7x:2x2x1
jax: 0.10.0
libtpu: 0.0.40
codegen_flags: <defaults>
</compile_context>

<pallas_src>
import functools
import math

import jax
import jax.numpy as jnp
from jax.experimental import pallas as pl
from jax.experimental.pallas import tpu as pltpu

_EPS = float(jnp.finfo(jnp.float32).eps)
_TEN_OVER_LN10 = 10.0 / math.log(10.0)


# --------------------------------------------------------------------------
# Kernel 1: streamed per-row SI-SDR.
# grid = (row_tiles, time_tiles); time (reduction) axis last / "arbitrary".
# --------------------------------------------------------------------------
def _sisdr_rows_kernel(sep_ref, tgt_ref, out_ref, d_ref, et_ref, ep_ref,
                       *, t_true, block_t, mask_t):
    t = pl.program_id(1)

    @pl.when(t == 0)
    def _():
        d_ref[...] = jnp.zeros_like(d_ref)
        et_ref[...] = jnp.zeros_like(et_ref)
        ep_ref[...] = jnp.zeros_like(ep_ref)

    # Cast to f32 inside the kernel (inputs may be bf16 in HBM).
    p = sep_ref[...].astype(jnp.float32)
    g = tgt_ref[...].astype(jnp.float32)

    if mask_t:
        # Only emitted when T is not a multiple of the time tile: zero out
        # out-of-range lanes so the partial sums stay exact.
        lane = jax.lax.broadcasted_iota(jnp.int32, p.shape, 1) + t * block_t
        valid = lane < t_true
        p = jnp.where(valid, p, 0.0)
        g = jnp.where(valid, g, 0.0)

    d_ref[...] += jnp.sum(p * g, axis=-1, keepdims=True)
    et_ref[...] += jnp.sum(g * g, axis=-1, keepdims=True)
    ep_ref[...] += jnp.sum(p * p, axis=-1, keepdims=True)

    @pl.when(t == pl.num_programs(1) - 1)
    def _():
        d = d_ref[...]
        et = et_ref[...]
        ep = ep_ref[...]
        scale = (d + _EPS) / (et + _EPS)
        s_et = scale * scale * et
        num = s_et + _EPS
        den = s_et - 2.0 * scale * d + ep + _EPS
        # 10*log10(num/den) as (10/ln10)*(log(num)-log(den)) -> EUP, no divide.
        out_ref[...] = (_TEN_OVER_LN10 * (jnp.log(num) - jnp.log(den))
                        ).astype(out_ref.dtype)


# --------------------------------------------------------------------------
# Kernel 2: reduce per-row SI-SDR to scalar loss (+ optional CE term).
# --------------------------------------------------------------------------
def _finalize_train_kernel(sisdr_ref, logits_ref, labels_ref, out_ref,
                           *, alpha, beta, n_rows):
    s = sisdr_ref[...]                                           # (R, 1)
    rows = jax.lax.broadcasted_iota(jnp.int32, s.shape, 0)
    s = jnp.where(rows < n_rows, s, 0.0)                         # drop pad rows
    loss = -beta * (jnp.sum(s) / float(n_rows))

    logits = logits_ref[...].astype(jnp.float32)                 # (Nce, C)
    labels = labels_ref[...]                                     # (Nce, 1) int32
    n, c = logits.shape
    m = jnp.max(logits, axis=-1, keepdims=True)
    lse = jnp.log(jnp.sum(jnp.exp(logits - m), axis=-1, keepdims=True)) + m
    cls = jax.lax.broadcasted_iota(jnp.int32, (n, c), 1)
    picked = jnp.sum(jnp.where(cls == labels, logits, 0.0),
                     axis=-1, keepdims=True)
    ce = jnp.sum(lse - picked) / float(n)

    out_ref[0, 0] = loss + alpha * ce


def _finalize_eval_kernel(sisdr_ref, out_ref, *, beta, n_rows):
    s = sisdr_ref[...]
    rows = jax.lax.broadcasted_iota(jnp.int32, s.shape, 0)
    s = jnp.where(rows < n_rows, s, 0.0)
    out_ref[0, 0] = -beta * (jnp.sum(s) / float(n_rows))


# --------------------------------------------------------------------------
# Wrapper
# --------------------------------------------------------------------------
def super_loss(separated, target_wave, speaker_id, predicted_speakers,
               is_train=True, alpha=0.5, beta=1.0):
    """Pallas implementation of SuperLoss.forward. Returns a scalar."""
    t_len = separated.shape[-1]
    sep2d = separated.reshape(-1, t_len)          # keep caller dtype (bf16 ok)
    tgt2d = target_wave.reshape(-1, t_len)
    n_rows = sep2d.shape[0]

    # Row tile: multiple of 8 (or the full row count when it is < 8 / ragged),
    # capped at 256 rows.
    if n_rows % 8 == 0:
        tn = min(256, n_rows)
    elif n_rows < 8:
        tn = n_rows                               # block == full dim (allowed)
    else:
        tn = min(256, ((n_rows + 7) // 8) * 8)    # ragged last tile, masked
    n_row_tiles = pl.cdiv(n_rows, tn)

    # Time tile: multiple of 128, capped at 2048 (2 MiB f32 per buffer ->
    # ~8 MiB double-buffered pipeline; fits v7x/v5e scoped VMEM comfortably).
    tt = min(2048, ((t_len + 127) // 128) * 128)
    n_t_tiles = pl.cdiv(t_len, tt)
    mask_t = (t_len % tt) != 0

    sisdr_kernel = functools.partial(
        _sisdr_rows_kernel, t_true=t_len, block_t=tt, mask_t=mask_t)

    sisdr_rows = pl.pallas_call(
        sisdr_kernel,
        out_shape=jax.ShapeDtypeStruct((n_row_tiles * tn, 1), jnp.float32),
        grid_spec=pltpu.PrefetchScalarGridSpec(
            num_scalar_prefetch=0,
            grid=(n_row_tiles, n_t_tiles),
            in_specs=[pl.BlockSpec((tn, tt), lambda i, t: (i, t)),
                      pl.BlockSpec((tn, tt), lambda i, t: (i, t))],
            out_specs=pl.BlockSpec((tn, 1), lambda i, t: (i, 0)),
            scratch_shapes=[pltpu.VMEM((tn, 1), jnp.float32),
                            pltpu.VMEM((tn, 1), jnp.float32),
                            pltpu.VMEM((tn, 1), jnp.float32)]),
        compiler_params=pltpu.CompilerParams(
            dimension_semantics=("parallel", "arbitrary")),
    )(sep2d, tgt2d)

    if is_train:
        logits = predicted_speakers
        labels = speaker_id.reshape(-1, 1).astype(jnp.int32)
        # TODO(synk): labels could live in SMEM; kept as a tiny VMEM block for
        # robust lowering of the one-hot gather.
        fin_kernel = functools.partial(
            _finalize_train_kernel, alpha=float(alpha), beta=float(beta),
            n_rows=n_rows)
        out = pl.pallas_call(
            fin_kernel,
            out_shape=jax.ShapeDtypeStruct((1, 1), jnp.float32),
            in_specs=[pl.BlockSpec(memory_space=pltpu.MemorySpace.VMEM),
                      pl.BlockSpec(memory_space=pltpu.MemorySpace.VMEM),
                      pl.BlockSpec(memory_space=pltpu.MemorySpace.VMEM)],
            out_specs=pl.BlockSpec(memory_space=pltpu.MemorySpace.SMEM),
        )(sisdr_rows, logits, labels)
    else:
        # Eval path: CE inputs are never passed, so no dead DMA traffic.
        fin_kernel = functools.partial(
            _finalize_eval_kernel, beta=float(beta), n_rows=n_rows)
        out = pl.pallas_call(
            fin_kernel,
            out_shape=jax.ShapeDtypeStruct((1, 1), jnp.float32),
            in_specs=[pl.BlockSpec(memory_space=pltpu.MemorySpace.VMEM)],
            out_specs=pl.BlockSpec(memory_space=pltpu.MemorySpace.SMEM),
        )(sisdr_rows)

    return out[0, 0]


# --------------------------------------------------------------------------
# Pure-JAX reference (mirrors torchmetrics SI-SDR + torch CrossEntropyLoss).
# --------------------------------------------------------------------------
def _reference_super_loss(separated, target_wave, speaker_id,
                          predicted_speakers, is_train=True,
                          alpha=0.5, beta=1.0):
    eps = float(jnp.finfo(jnp.float32).eps)
    p = separated.reshape(-1, separated.shape[-1]).astype(jnp.float32)
    t = target_wave.reshape(-1, target_wave.shape[-1]).astype(jnp.float32)
    a = (jnp.sum(p * t, -1, keepdims=True) + eps) / \
        (jnp.sum(t * t, -1, keepdims=True) + eps)
    ts = a * t
    sisdr = 10.0 * jnp.log10((jnp.sum(ts * ts, -1) + eps) /
                             (jnp.sum((ts - p) ** 2, -1) + eps))
    loss = -beta * jnp.mean(sisdr)
    if is_train:
        logp = jax.nn.log_softmax(predicted_speakers.astype(jnp.float32), -1)
        ce = -jnp.mean(jnp.take_along_axis(logp, speaker_id.reshape(-1, 1), -1))
        loss = loss + alpha * ce
    return loss


if __name__ == "__main__":
    def run_case(key, B, S, T, C, is_train):
        k1, k2, k3, k4 = jax.random.split(key, 4)
        separated = jax.random.normal(k1, (B, S, T), dtype=jnp.float32)
        target_wave = jax.random.normal(k2, (B, S, T), dtype=jnp.float32)
        logits = jax.random.normal(k3, (B * S, C), dtype=jnp.float32)
        labels = jax.random.randint(k4, (B * S,), 0, C, dtype=jnp.int32)

        out = jax.block_until_ready(
            super_loss(separated, target_wave, labels, logits,
                       is_train=is_train))
        ref = _reference_super_loss(separated, target_wave, labels, logits,
                                    is_train=is_train)
        assert jnp.allclose(out, ref, rtol=1e-4, atol=1e-4), \
            (B, S, T, C, is_train, out, ref)

    key = jax.random.PRNGKey(0)
    keys = jax.random.split(key, 4)
    run_case(keys[0], 2, 2, 256, 8, True)    # single tile, train path
    run_case(keys[1], 2, 2, 256, 8, False)   # eval path (no CE inputs)
    run_case(keys[2], 2, 3, 1000, 10, True)  # T % 128 != 0 -> lane masking
    run_case(keys[3], 4, 4, 2176, 8, True)   # multiple time tiles + masked tail

    print("KERNEL_OK")
</pallas_src>

<mosaic_0001>
module attributes {stable_mosaic.version = 11 : i64} {
  func.func @_sisdr_rows_kernel(%arg0: i32, %arg1: i32, %arg2: memref<4x256xf32, #tpu.memory_space<vmem>>, %arg3: memref<4x256xf32, #tpu.memory_space<vmem>>, %arg4: memref<4x1xf32, #tpu.memory_space<vmem>>, %arg5: memref<4x1xf32, #tpu.memory_space<vmem>>, %arg6: memref<4x1xf32, #tpu.memory_space<vmem>>, %arg7: memref<4x1xf32, #tpu.memory_space<vmem>>) attributes {dimension_semantics = [#tpu.dimension_semantics<parallel>, #tpu.dimension_semantics<arbitrary>], iteration_bounds = array<i64: 1, 1>, scalar_prefetch = 0 : i64, scratch_operands = 3 : i64, tpu.core_type = #tpu.core_type<tc>, window_params = [{transform_indices = @transform_0, window_bounds = array<i64: 4, 256>}, {transform_indices = @transform_1, window_bounds = array<i64: 4, 256>}, {transform_indices = @transform_2, window_bounds = array<i64: 4, 1>}]} {
    %c0_i32 = arith.constant 0 : i32
    %0 = arith.cmpi eq, %arg1, %c0_i32 : i32
    %1 = arith.extui %0 : i1 to i32
    %c0_i32_0 = arith.constant 0 : i32
    %2 = arith.cmpi ne, %1, %c0_i32_0 : i32
    scf.if %2 {
      %cst_20 = arith.constant 0.000000e+00 : f32
      %26 = vector.broadcast %cst_20 : f32 to vector<4x1xf32>
      %c0_21 = arith.constant 0 : index
      %c0_22 = arith.constant 0 : index
      %27 = vector.load %arg5[%c0_21, %c0_22] : memref<4x1xf32, #tpu.memory_space<vmem>>, vector<4x1xf32>
      tpu.vector_store %arg5[%c0_21, %c0_22], %26 {strides = array<i32>} : memref<4x1xf32, #tpu.memory_space<vmem>>, vector<4x1xf32>,
      %cst_23 = arith.constant 0.000000e+00 : f32
      %28 = vector.broadcast %cst_23 : f32 to vector<4x1xf32>
      %c0_24 = arith.constant 0 : index
      %c0_25 = arith.constant 0 : index
      %29 = vector.load %arg6[%c0_24, %c0_25] : memref<4x1xf32, #tpu.memory_space<vmem>>, vector<4x1xf32>
      tpu.vector_store %arg6[%c0_24, %c0_25], %28 {strides = array<i32>} : memref<4x1xf32, #tpu.memory_space<vmem>>, vector<4x1xf32>,
      %cst_26 = arith.constant 0.000000e+00 : f32
      %30 = vector.broadcast %cst_26 : f32 to vector<4x1xf32>
      %c0_27 = arith.constant 0 : index
      %c0_28 = arith.constant 0 : index
      %31 = vector.load %arg7[%c0_27, %c0_28] : memref<4x1xf32, #tpu.memory_space<vmem>>, vector<4x1xf32>
      tpu.vector_store %arg7[%c0_27, %c0_28], %30 {strides = array<i32>} : memref<4x1xf32, #tpu.memory_space<vmem>>, vector<4x1xf32>,
    } else {
    }
    %c0 = arith.constant 0 : index
    %c0_1 = arith.constant 0 : index
    %3 = vector.load %arg2[%c0, %c0_1] : memref<4x256xf32, #tpu.memory_space<vmem>>, vector<4x256xf32>
    %c0_2 = arith.constant 0 : index
    %c0_3 = arith.constant 0 : index
    %4 = vector.load %arg3[%c0_2, %c0_3] : memref<4x256xf32, #tpu.memory_space<vmem>>, vector<4x256xf32>
    %c0_4 = arith.constant 0 : index
    %c0_5 = arith.constant 0 : index
    %5 = vector.load %arg5[%c0_4, %c0_5] : memref<4x1xf32, #tpu.memory_space<vmem>>, vector<4x1xf32>
    %6 = arith.mulf %3, %4 : vector<4x256xf32>
    %cst = arith.constant dense<0.000000e+00> : vector<4xf32>
    %7 = vector.multi_reduction <add>, %6, %cst [1] : vector<4x256xf32> to vector<4xf32>
    %8 = vector.shape_cast %7 : vector<4xf32> to vector<4x1xf32>
    %9 = arith.addf %5, %8 : vector<4x1xf32>
    %c0_6 = arith.constant 0 : index
    %c0_7 = arith.constant 0 : index
    %10 = vector.load %arg5[%c0_6, %c0_7] : memref<4x1xf32, #tpu.memory_space<vmem>>, vector<4x1xf32>
    tpu.vector_store %arg5[%c0_6, %c0_7], %9 {strides = array<i32>} : memref<4x1xf32, #tpu.memory_space<vmem>>, vector<4x1xf32>,
    %c0_8 = arith.constant 0 : index
    %c0_9 = arith.constant 0 : index
    %11 = vector.load %arg6[%c0_8, %c0_9] : memref<4x1xf32, #tpu.memory_space<vmem>>, vector<4x1xf32>
    %12 = arith.mulf %4, %4 : vector<4x256xf32>
    %cst_10 = arith.constant dense<0.000000e+00> : vector<4xf32>
    %13 = vector.multi_reduction <add>, %12, %cst_10 [1] : vector<4x256xf32> to vector<4xf32>
    %14 = vector.shape_cast %13 : vector<4xf32> to vector<4x1xf32>
    %15 = arith.addf %11, %14 : vector<4x1xf32>
    %c0_11 = arith.constant 0 : index
    %c0_12 = arith.constant 0 : index
    %16 = vector.load %arg6[%c0_11, %c0_12] : memref<4x1xf32, #tpu.memory_space<vmem>>, vector<4x1xf32>
    tpu.vector_store %arg6[%c0_11, %c0_12], %15 {strides = array<i32>} : memref<4x1xf32, #tpu.memory_space<vmem>>, vector<4x1xf32>,
    %c0_13 = arith.constant 0 : index
    %c0_14 = arith.constant 0 : index
    %17 = vector.load %arg7[%c0_13, %c0_14] : memref<4x1xf32, #tpu.memory_space<vmem>>, vector<4x1xf32>
    %18 = arith.mulf %3, %3 : vector<4x256xf32>
    %cst_15 = arith.constant dense<0.000000e+00> : vector<4xf32>
    %19 = vector.multi_reduction <add>, %18, %cst_15 [1] : vector<4x256xf32> to vector<4xf32>
    %20 = vector.shape_cast %19 : vector<4xf32> to vector<4x1xf32>
    %21 = arith.addf %17, %20 : vector<4x1xf32>
    %c0_16 = arith.constant 0 : index
    %c0_17 = arith.constant 0 : index
    %22 = vector.load %arg7[%c0_16, %c0_17] : memref<4x1xf32, #tpu.memory_space<vmem>>, vector<4x1xf32>
    tpu.vector_store %arg7[%c0_16, %c0_17], %21 {strides = array<i32>} : memref<4x1xf32, #tpu.memory_space<vmem>>, vector<4x1xf32>,
    %c0_i32_18 = arith.constant 0 : i32
    %23 = arith.cmpi eq, %arg1, %c0_i32_18 : i32
    %24 = arith.extui %23 : i1 to i32
    %c0_i32_19 = arith.constant 0 : i32
    %25 = arith.cmpi ne, %24, %c0_i32_19 : i32
    scf.if %25 {
      %c0_20 = arith.constant 0 : index
      %c0_21 = arith.constant 0 : index
      %26 = vector.load %arg5[%c0_20, %c0_21] : memref<4x1xf32, #tpu.memory_space<vmem>>, vector<4x1xf32>
      %c0_22 = arith.constant 0 : index
      %c0_23 = arith.constant 0 : index
      %27 = vector.load %arg6[%c0_22, %c0_23] : memref<4x1xf32, #tpu.memory_space<vmem>>, vector<4x1xf32>
      %c0_24 = arith.constant 0 : index
      %c0_25 = arith.constant 0 : index
      %28 = vector.load %arg7[%c0_24, %c0_25] : memref<4x1xf32, #tpu.memory_space<vmem>>, vector<4x1xf32>
      %cst_26 = arith.constant 1.1920929E-7 : f32
      %29 = vector.broadcast %cst_26 : f32 to vector<4x1xf32>
      %30 = arith.addf %26, %29 : vector<4x1xf32>
      %cst_27 = arith.constant 1.1920929E-7 : f32
      %31 = vector.broadcast %cst_27 : f32 to vector<4x1xf32>
      %32 = arith.addf %27, %31 : vector<4x1xf32>
      %33 = arith.divf %30, %32 : vector<4x1xf32>
      %34 = arith.mulf %33, %33 : vector<4x1xf32>
      %35 = arith.mulf %34, %27 : vector<4x1xf32>
      %cst_28 = arith.constant 1.1920929E-7 : f32
      %36 = vector.broadcast %cst_28 : f32 to vector<4x1xf32>
      %37 = arith.addf %35, %36 : vector<4x1xf32>
      %cst_29 = arith.constant 2.000000e+00 : f32
      %38 = vector.broadcast %cst_29 : f32 to vector<4x1xf32>
      %39 = arith.mulf %38, %33 : vector<4x1xf32>
      %40 = arith.mulf %39, %26 : vector<4x1xf32>
      %41 = arith.subf %35, %40 : vector<4x1xf32>
      %42 = arith.addf %41, %28 : vector<4x1xf32>
      %cst_30 = arith.constant 1.1920929E-7 : f32
      %43 = vector.broadcast %cst_30 : f32 to vector<4x1xf32>
      %44 = arith.addf %42, %43 : vector<4x1xf32>
      %45 = math.log %37 : vector<4x1xf32>
      %46 = math.log %44 : vector<4x1xf32>
      %47 = arith.subf %45, %46 : vector<4x1xf32>
      %cst_31 = arith.constant 4.34294462 : f32
      %48 = vector.broadcast %cst_31 : f32 to vector<4x1xf32>
      %49 = arith.mulf %48, %47 : vector<4x1xf32>
      %c0_32 = arith.constant 0 : index
      %c0_33 = arith.constant 0 : index
      %50 = vector.load %arg4[%c0_32, %c0_33] : memref<4x1xf32, #tpu.memory_space<vmem>>, vector<4x1xf32>
      tpu.vector_store %arg4[%c0_32, %c0_33], %49 {strides = array<i32>} : memref<4x1xf32, #tpu.memory_space<vmem>>, vector<4x1xf32>,
    } else {
    }
    return
  }
  func.func @transform_0(%arg0: i32, %arg1: i32) -> (i32, i32) {
    %c0_i32 = arith.constant 0 : i32
    return %arg0, %arg1 : i32, i32
  }
  func.func @transform_1(%arg0: i32, %arg1: i32) -> (i32, i32) {
    %c0_i32 = arith.constant 0 : i32
    return %arg0, %arg1 : i32, i32
  }
  func.func @transform_2(%arg0: i32, %arg1: i32) -> (i32, i32) {
    %c0_i32 = arith.constant 0 : i32
    %c0_i32_0 = arith.constant 0 : i32
    return %arg0, %c0_i32 : i32, i32
  }
}

</mosaic_0001>

<bundles_post_ra>
// kernel: tpu_custom_call.1
= control target key start
LH: loop header
LB: loop body
LE: loop exit
PB: predicated region body
PF: predicated region fallthrough
CT: control target
= control target key end

     0   :  { %7 = vsyncpa [#allocation6], 0  ;;  %s223_s0 = inlined_call_operand.hbm [shape: f32[4,256], index: 0, kind: input, shape index: {}]   ;;  %s224_s1 = inlined_call_operand.hbm [shape: f32[4,256], index: 1, kind: input, shape index: {}]   ;;  %s225_s2 = inlined_call_operand.vmem [shape: f32[4,1], index: 2, kind: output, shape index: {}]  }
   0x1   :  { %8 = vsyncpa [#allocation8], 0  ;;  %s171_s9 = smov [#allocation5]   ;;  %s172_s11 = smov [#allocation7]  }
   0x2   :  { %s15_s10 = sshll.u32 %s171_s9, 4  ;;  %s25_s12 = sshll.u32 %s172_s11, 4  ;;  %s16_s10 = int_to_ptr.vmem [resolvable:$true] %s15_s10  ;;  %s26_s12 = int_to_ptr.vmem [resolvable:$true] %s25_s12 }
   0x3   :  { %s123_s15 = scalar_lea.hbm %s223_s0, 128 }
   0x4   :  { %p124_p0 = scmp.ne.s32.totalorder %s223_s0, %s123_s15  ;;  %p127_p1 = scmp.lt.u32.totalorder %s123_s15, %s223_s0 }
   0x6   :  { %p129_p2 = pnand %p127_p1, %p124_p0 }
   0x8   :  { %132 = shalt.err (!%p129_p2)
}
   0x9   :  { %s133_s20 = scalar_lea.vmem %s16_s10, 128  ;;  %p138_p4 = scmp.lt.s32.totalorder %s16_s10, %s16_s10 }
   0xa   :  { %p134_p3 = scmp.ne.s32.totalorder %s16_s10, %s133_s20  ;;  %p139_p5 = scmp.lt.s32.totalorder %s133_s20, %s133_s20 }
   0xc   :  { %p140_p6 = por %p139_p5, %p138_p4 }
   0xe   :  { %p141_p7 = pnand %p140_p6, %p134_p3 }
  0x10   :  { %144 = shalt.err (!%p141_p7)
}
  0x11   :  { %18 = dma.hbm_to_vmem [thread:$0]  %s223_s0, 128, %s16_s10, [#allocation6]  }
  0x12   :  { %s145_s25 = scalar_lea.hbm %s224_s1, 128 }
  0x13   :  { %p146_p8 = scmp.ne.s32.totalorder %s224_s1, %s145_s25  ;;  %p149_p9 = scmp.lt.u32.totalorder %s145_s25, %s224_s1 }
  0x15   :  { %p151_p10 = pnand %p149_p9, %p146_p8 }
  0x17   :  { %154 = shalt.err (!%p151_p10)
}
  0x18   :  { %s155_s30 = scalar_lea.vmem %s26_s12, 128  ;;  %p160_p12 = scmp.lt.s32.totalorder %s26_s12, %s26_s12 }
  0x19   :  { %p156_p11 = scmp.ne.s32.totalorder %s26_s12, %s155_s30  ;;  %p161_p13 = scmp.lt.s32.totalorder %s155_s30, %s155_s30 }
  0x1b   :  { %p162_p0 = por %p161_p13, %p160_p12 }
  0x1d   :  { %p163_p1 = pnand %p162_p0, %p156_p11 }
  0x1f   :  { %166 = shalt.err (!%p163_p1)
}
  0x20   :  { %28 = dma.hbm_to_vmem [thread:$0]  %s224_s1, 128, %s26_s12, [#allocation8]  }
  0x21   :  { %167 = dma.done.wait [#allocation6], 128  }
  0x22   :  { %168 = vsyncadd [#allocation6], 4294967168 }
  0x23   :  { %169 = dma.done.wait [#allocation8], 128  }
  0x24   :  { %170 = vsyncadd [#allocation8], 4294967168  ;;  %vm39_vm0 = vcmask 3072   ;;  %v173_v0 = vmov 0.0   ;;  %v44_v1 = vld [vmem:[#allocation7] sm:$0xff]  ;;  %vm50_vm1 = vcmask 1043456  }
  0x25   :  { %41 = vst.msk [vmem:[#allocation3] sm:$0xf] %vm39_vm0, %v173_v0  ;;  %40 = vst.msk [vmem:[#allocation2] sm:$0xf] %vm39_vm0, %v173_v0  ;;  %v43_v2 = vld [vmem:[#allocation5] sm:$0xff]  ;;  %v60_v3 = vmul.f32 %v44_v1, %v44_v1 }
  0x26   :  { %42 = vst.msk [vmem:[#allocation4] sm:$0xf] %vm39_vm0, %v173_v0  ;;  %v46_v4 = vmul.f32 %v44_v1, %v43_v2  ;;  %v72_v5 = vmul.f32 %v43_v2, %v43_v2 }
  0x27   :  { %v62_v6 = vcombine.high %v60_v3, %v60_v3  ;;  %v64_v7 = vsel %vm50_vm1, %v60_v3, 0.0 }
  0x28   :  { %v48_v8 = vcombine.high %v46_v4, %v46_v4  ;;  %v74_v9 = vcombine.high %v72_v5, %v72_v5  ;;  %v76_v10 = vsel %vm50_vm1, %v72_v5, 0.0  ;;  %v51_v12 = vsel %vm50_vm1, %v46_v4, 0.0 }
  0x29   :  { %v65_v11 = vsel %vm50_vm1, %v62_v6, 0.0 }
  0x2a   :  { %v52_v13 = vsel %vm50_vm1, %v48_v8, 0.0  ;;  %v66_v14 = vadd.f32 %v65_v11, %v64_v7  ;;  %v77_v15 = vsel %vm50_vm1, %v74_v9, 0.0 }
  0x2b   :  { %v78_v16 = vadd.f32 %v77_v15, %v76_v10  ;;  %v53_v17 = vadd.f32 %v52_v13, %v51_v12 }
  0x2c   :  { %67 = vadd.xlane.f32.xlu0 %v66_v14  ;;  %v59_v18 = vld [vmem:[#allocation3] sm:$0xf]  ;;  %v45_v23 = vld [vmem:[#allocation2] sm:$0xf] }
  0x2d   :  { %79 = vadd.xlane.f32.xlu1 %v78_v16  ;;  %v71_v19 = vld [vmem:[#allocation4] sm:$0xf] }
  0x30   :  { %54 = vadd.xlane.f32.xlu0 %v53_v17 }
  0xb9   :  { %v68_v20 = vpop.xlane.xlu0 %67 }
  0xba   :  { %v69_v21 = vadd.f32 %v68_v20, %v59_v18  ;;  %v80_v22 = vpop.xlane.xlu1 %79 }
  0xbb   :  { %v81_v24 = vadd.f32 %v80_v22, %v71_v19 }
  0xbc   :  { %70 = vst.msk [vmem:[#allocation3] sm:$0xf] %vm39_vm0, %v69_v21 }
  0xbd   :  { %v55_v25 = vpop.xlane.xlu0 %54  ;;  %82 = vst.msk [vmem:[#allocation4] sm:$0xf] %vm39_vm0, %v81_v24 }
  0xbe   :  { %v56_v26 = vadd.f32 %v55_v25, %v45_v23 }
  0xc0   :  { %58 = vst.msk [vmem:[#allocation2] sm:$0xf] %vm39_vm0, %v56_v26 }
  0xc3   :  { %v87_v27 = vld [vmem:[#allocation3] sm:$0xf] }
  0xc4   :  { %v90_v28 = vadd.f32 1.1920929e-07, %v87_v27  ;;  %v88_v37 = vld [vmem:[#allocation4] sm:$0xf] }
  0xc6   :  { %117 = vrcp.f32 %v90_v28 }
  0xc7   :  { %v86_v29 = vld [vmem:[#allocation2] sm:$0xf] }
  0xc8   :  { %v89_v30 = vadd.f32 1.1920929e-07, %v86_v29 }
  0xd0   :  { %v118_v31 = vpop.eup %117 }
  0xd1   :  { %v92_v32 = vmul.f32 %v118_v31, %v89_v30 }
  0xd3   :  { %v93_v33 = vmul.f32 %v92_v32, %v92_v32  ;;  %v96_v34 = vmul.f32 2.0, %v92_v32 }
  0xd5   :  { %v97_v35 = vmul.f32 %v96_v34, %v86_v29  ;;  %v94_v36 = vmul.f32 %v93_v33, %v87_v27 }
  0xd7   :  { %v95_v38 = vadd.f32 1.1920929e-07, %v94_v36  ;;  %v98_v39 = vsub.f32 %v94_v36, %v97_v35 }
  0xd9   :  { %v99_v40 = vadd.f32 %v98_v39, %v88_v37  ;;  %119 = vlog2.f32 %v95_v38 }
  0xdb   :  { %v100_v41 = vadd.f32 1.1920929e-07, %v99_v40 }
  0xdd   :  { %121 = vlog2.f32 %v100_v41 }
  0xe3   :  { %v120_v42 = vpop.eup %119 }
  0xe4   :  { %v102_v44 = vmul.f32 0.6931472, %v120_v42 }
  0xe7   :  { %v122_v43 = vpop.eup %121 }
  0xe8   :  { %v104_v45 = vmul.f32 0.6931472, %v122_v43 }
  0xea   :  { %v105_v46 = vsub.f32 %v102_v44, %v104_v45 }
  0xec   :  { %v106_v47 = vmul.f32 4.3429446, %v105_v46 }
  0xee   :  { %107 = vst.msk [vmem:[%s225_s2] sm:$0xf] %vm39_vm0, %v106_v47 }
  0xef   :  { %112 = vsyncpa [#allocation6], 1 }
  0xf0   :  { %113 = vsyncpa [#allocation8], 1 }

</bundles_post_ra>
